<compile_context>
chip_gen: v5e
topology: v5e:2x2
jax: 0.10.0
libtpu: 0.0.40
codegen_flags: <defaults>
</compile_context>

<pallas_src>
import jax
import jax.numpy as jnp
from jax.experimental import pallas as pl
from jax.experimental.pallas import tpu as pltpu

_H1_PAD = 128                    # layer-1 width (100) padded up to a full lane multiple
_H2, _H3, _H4 = 64, 32, 1
_MIN_TILE = 128                  # lane-multiple rows -> lane-dense (1, tile) output row
_VMEM_BUDGET_BYTES = 32 * 1024 * 1024  # working-set budget: headroom on v7x's 64 MiB
                                       # physical VMEM, and well above v5e's 16 MiB
                                       # default scoped limit (which we raise explicitly)


def _round_up(n, m):
    return ((n + m - 1) // m) * m


def _prelu(h, a):
    # PReLU with a single shared parameter (PyTorch default num_parameters=1).
    return jnp.where(h > 0, h, a * h)


def mlp_kernel(
    a1_ref, a2_ref, a3_ref,          # scalar PReLU params (SMEM)
    x_ref,                           # (tile, D) batch tile (pipelined input)
    w1_ref, b1_ref,                  # weights/biases: full-resident VMEM (single copy)
    w2_ref, b2_ref,
    w3_ref, b3_ref,
    w4_ref, b4_ref,
    o_ref,                           # (1, tile) lane-dense output row
):
    cd = w1_ref.dtype                # MXU operand dtype (f32 or bf16)
    x = x_ref[...].astype(cd)        # cast on the resident tile, not in the wrapper

    h = jnp.dot(x, w1_ref[...], preferred_element_type=jnp.float32) + b1_ref[...]
    h = _prelu(h, a1_ref[0])

    h = jnp.dot(h.astype(cd), w2_ref[...], preferred_element_type=jnp.float32) + b2_ref[...]
    h = _prelu(h, a2_ref[0])

    h = jnp.dot(h.astype(cd), w3_ref[...], preferred_element_type=jnp.float32) + b3_ref[...]
    h = _prelu(h, a3_ref[0])

    # Layer 4 (K=32, N=1) uses a sliver of the MXU.  TODO(synk): if a bundle
    # dump shows MXU cadence as the binding slot, replace this dot + transpose
    # with a VPU/XLU reduction written lane-dense; measure first.
    h = jnp.dot(h.astype(cd), w4_ref[...], preferred_element_type=jnp.float32) + b4_ref[...]

    # (tile, 1) -> (1, tile): one small XLU transpose per tile instead of
    # width-1 masked vst.msk stores.
    o_ref[...] = h.T.astype(o_ref.dtype)


def prepare_params(params, compute_dtype=jnp.float32):
    """One-time weight prep (call at init, NOT per forward call).

    * zero-pads layer-1 width 100 -> 128 (mathematical no-op: PReLU(0)=0 and
      the matching rows of w2 are zero),
    * casts weights to the MXU operand dtype.  bf16 is a fast path on v5e, v6e
      and v7x alike (v5e benefits most: lowest HBM bandwidth); bias adds,
      PReLU and accumulation stay f32.  Note bf16 also rounds x inside the
      kernel -- callers with wide-dynamic-range inputs should keep f32.
    """
    (w1, b1, a1, w2, b2, a2, w3, b3, a3, w4, b4) = params
    h1 = w1.shape[1]
    assert h1 <= _H1_PAD
    w1 = jnp.pad(w1, ((0, 0), (0, _H1_PAD - h1)))
    b1 = jnp.pad(b1, ((0, 0), (0, _H1_PAD - h1)))
    w2 = jnp.pad(w2, ((0, _H1_PAD - h1), (0, 0)))
    cd = jnp.dtype(compute_dtype)
    w1, w2, w3, w4 = (w.astype(cd) for w in (w1, w2, w3, w4))
    f32 = lambda b: b.astype(jnp.float32)
    return (w1, f32(b1), a1, w2, f32(b2), a2, w3, f32(b3), a3, w4, f32(b4))


def _derive_tile_and_vmem(B, D, x_itemsize, cd_itemsize, fixed_bytes,
                          max_batch_tile, vmem_budget_bytes):
    """Pick the largest lane-multiple batch tile that fits the VMEM budget."""
    per_row = 2 * D * x_itemsize                 # x tile, double-buffered by the pipeline
    per_row += 2 * 4                             # (1, tile) f32 output row, double-buffered
    per_row += (_H1_PAD + _H2 + _H3 + 8) * 4     # f32 intermediates h1..h3 (+ slack)
    if cd_itemsize < 4:                          # bf16 copies fed to the MXU
        per_row += (D + _H1_PAD + _H2 + _H3) * cd_itemsize

    avail = max(vmem_budget_bytes - fixed_bytes, per_row * _MIN_TILE)
    tile = min(max_batch_tile, avail // per_row)
    tile = max(_MIN_TILE, (tile // _MIN_TILE) * _MIN_TILE)
    tile = min(tile, _round_up(B, _MIN_TILE))    # never wider than the lane-rounded batch

    # Explicit scoped-VMEM limit = actual need + headroom (floor = 32 MiB):
    # v5e's default scoped cap is only 16 MiB (would reject / under-buffer the
    # larger tile) and v7x has only 64 MiB physical (a blind large limit OOMs).
    vmem_limit = int(max(fixed_bytes + per_row * tile + (8 << 20), 32 << 20))
    return int(tile), vmem_limit


def linear_regression_forward(x, prepared_params, *, max_batch_tile=2048,
                              vmem_budget_bytes=_VMEM_BUDGET_BYTES):
    """Pallas forward of the 4-layer MLP.

    `prepared_params` must come from prepare_params() (padded / pre-cast once
    at init -- the per-call path does no weight copies and no x copies).
    """
    (w1, b1, a1, w2, b2, a2, w3, b3, a3, w4, b4) = prepared_params
    B, D = x.shape
    assert w1.shape == (D, _H1_PAD)

    weights = (w1, b1, w2, b2, w3, b3, w4, b4)
    fixed_bytes = sum(int(a.size) * a.dtype.itemsize for a in weights)
    tile, vmem_limit = _derive_tile_and_vmem(
        B, D, x.dtype.itemsize, w1.dtype.itemsize, fixed_bytes,
        max_batch_tile, vmem_budget_bytes)
    num_tiles = pl.cdiv(B, tile)

    # Ragged batches rely on Pallas edge-block handling: the last x tile may
    # contain undefined rows past B and the matching output columns are
    # masked on store.  Safe ONLY because every op in the kernel is row-local
    # (matmuls contract over features, PReLU is elementwise); a future
    # cross-row op (e.g. batchnorm) must mask the tail in-kernel instead.
    x_spec = pl.BlockSpec((tile, D), lambda i: (i, 0))
    out_spec = pl.BlockSpec((1, tile), lambda i: (0, i))
    # Weights/biases never change across the grid: keep them fully resident in
    # VMEM (single copy) instead of 2-deep pipelined blocks.
    vmem_resident = pl.BlockSpec(memory_space=pltpu.MemorySpace.VMEM)
    smem_scalar = pl.BlockSpec(memory_space=pltpu.MemorySpace.SMEM)

    work_rows = num_tiles * tile
    flops = 2 * work_rows * (D * _H1_PAD + _H1_PAD * _H2 + _H2 * _H3 + _H3 * _H4)
    bytes_accessed = x.size * x.dtype.itemsize + B * 4 + fixed_bytes

    out_row = pl.pallas_call(
        mlp_kernel,
        out_shape=jax.ShapeDtypeStruct((1, B), jnp.float32),
        grid=(num_tiles,),
        in_specs=[
            smem_scalar, smem_scalar, smem_scalar,    # a1, a2, a3
            x_spec,
            vmem_resident, vmem_resident,             # w1, b1
            vmem_resident, vmem_resident,             # w2, b2
            vmem_resident, vmem_resident,             # w3, b3
            vmem_resident, vmem_resident,             # w4, b4
        ],
        out_specs=out_spec,
        compiler_params=pltpu.CompilerParams(
            # "parallel" lets Mosaic shard the batch-tile axis across both
            # TensorCores on megacore parts (v7x).  TODO(synk): confirm 2-TC
            # sharding from a bundle dump; if it is a no-op there, switch this
            # axis to pltpu.CORE_PARALLEL (or an explicit core_map).  Batches
            # that fit a single tile necessarily run on one core.
            dimension_semantics=("parallel",),
            vmem_limit_bytes=vmem_limit,
        ),
        cost_estimate=pl.CostEstimate(
            flops=flops, transcendentals=0, bytes_accessed=bytes_accessed),
    )(a1, a2, a3, x, w1, b1, w2, b2, w3, b3, w4, b4)

    return out_row[0, :].reshape(B, 1)


def init_params(key, input_dim):
    """Deterministic init mimicking nn.Linear (uniform +-1/sqrt(fan_in)),
    PReLU alpha = 0.25.  Weights stored as (in, out)."""
    dims = [(input_dim, 100), (100, _H2), (_H2, _H3), (_H3, _H4)]
    params = []
    for li, (fin, fout) in enumerate(dims):
        key, kw, kb = jax.random.split(key, 3)
        bound = 1.0 / jnp.sqrt(fin)
        w = jax.random.uniform(kw, (fin, fout), jnp.float32, -bound, bound)
        b = jax.random.uniform(kb, (1, fout), jnp.float32, -bound, bound)
        params.extend([w, b])
        if li < 3:
            params.append(jnp.full((1,), 0.25, jnp.float32))
    # order: w1,b1,a1, w2,b2,a2, w3,b3,a3, w4,b4
    return tuple(params)


def reference_forward(x, params):
    (w1, b1, a1, w2, b2, a2, w3, b3, a3, w4, b4) = params
    h = x @ w1 + b1
    h = jnp.where(h > 0, h, a1[0] * h)
    h = h @ w2 + b2
    h = jnp.where(h > 0, h, a2[0] * h)
    h = h @ w3 + b3
    h = jnp.where(h > 0, h, a3[0] * h)
    return h @ w4 + b4


if __name__ == "__main__":
    key = jax.random.PRNGKey(0)
    key, kx1, kx2 = jax.random.split(key, 3)

    input_dim = 32
    params = init_params(key, input_dim)
    prepared = prepare_params(params)                       # f32 MXU operands
    prepared_bf16 = prepare_params(params, jnp.bfloat16)    # bf16 MXU operands

    # Small batch: single grid step, one partially-filled (128, D) edge block.
    x_small = jax.random.normal(kx1, (8, input_dim), jnp.float32)
    out_small = jax.block_until_ready(linear_regression_forward(x_small, prepared))
    ref_small = reference_forward(x_small, params)
    assert out_small.shape == (8, 1)
    assert jnp.allclose(out_small, ref_small, atol=1e-4, rtol=1e-4)

    # Ragged batch with a forced multi-step grid (tile=128 -> 3 steps, last one
    # partial): exercises edge-block reads/masked writes and the "parallel" axis.
    x_big = jax.random.normal(kx2, (300, input_dim), jnp.float32)
    out_big = jax.block_until_ready(
        linear_regression_forward(x_big, prepared, max_batch_tile=128))
    ref_big = reference_forward(x_big, params)
    assert out_big.shape == (300, 1)
    assert jnp.allclose(out_big, ref_big, atol=1e-4, rtol=1e-4)

    # Default (VMEM-budget-derived) tile: collapses this batch to one step.
    out_default = jax.block_until_ready(linear_regression_forward(x_big, prepared))
    assert jnp.allclose(out_default, ref_big, atol=1e-4, rtol=1e-4)

    # bf16 MXU operands (fast path on v5e/v6e/v7x), f32 accumulation; x streams
    # f32 and is cast in-kernel (no wrapper-side cast pass over HBM).
    out_bf16 = jax.block_until_ready(linear_regression_forward(x_big, prepared_bf16))
    assert jnp.allclose(out_bf16, ref_big, atol=1e-1, rtol=1e-1)

    print("KERNEL_OK")
</pallas_src>

<mosaic_0001>
module attributes {stable_mosaic.version = 11 : i64} {
  func.func @mlp_kernel(%arg0: i32, %arg1: memref<1xf32, #tpu.memory_space<smem>>, %arg2: memref<1xf32, #tpu.memory_space<smem>>, %arg3: memref<1xf32, #tpu.memory_space<smem>>, %arg4: memref<128x32xf32, #tpu.memory_space<vmem>>, %arg5: memref<32x128xf32, #tpu.memory_space<vmem>>, %arg6: memref<1x128xf32, #tpu.memory_space<vmem>>, %arg7: memref<128x64xf32, #tpu.memory_space<vmem>>, %arg8: memref<1x64xf32, #tpu.memory_space<vmem>>, %arg9: memref<64x32xf32, #tpu.memory_space<vmem>>, %arg10: memref<1x32xf32, #tpu.memory_space<vmem>>, %arg11: memref<32x1xf32, #tpu.memory_space<vmem>>, %arg12: memref<1x1xf32, #tpu.memory_space<vmem>>, %arg13: memref<1x128xf32, #tpu.memory_space<vmem>>) attributes {dimension_semantics = [#tpu.dimension_semantics<parallel>], iteration_bounds = array<i64: 1>, scalar_prefetch = 0 : i64, scratch_operands = 0 : i64, tpu.core_type = #tpu.core_type<tc>, window_params = [{transform_indices = @transform_0, window_bounds = array<i64: 1>}, {transform_indices = @transform_1, window_bounds = array<i64: 1>}, {transform_indices = @transform_2, window_bounds = array<i64: 1>}, {transform_indices = @transform_3, window_bounds = array<i64: 128, 32>}, {pipeline_mode = #tpu.pipeline_mode<synchronous>, transform_indices = @transform_4, window_bounds = array<i64: 32, 128>}, {pipeline_mode = #tpu.pipeline_mode<synchronous>, transform_indices = @transform_5, window_bounds = array<i64: 1, 128>}, {pipeline_mode = #tpu.pipeline_mode<synchronous>, transform_indices = @transform_6, window_bounds = array<i64: 128, 64>}, {pipeline_mode = #tpu.pipeline_mode<synchronous>, transform_indices = @transform_7, window_bounds = array<i64: 1, 64>}, {pipeline_mode = #tpu.pipeline_mode<synchronous>, transform_indices = @transform_8, window_bounds = array<i64: 64, 32>}, {pipeline_mode = #tpu.pipeline_mode<synchronous>, transform_indices = @transform_9, window_bounds = array<i64: 1, 32>}, {pipeline_mode = #tpu.pipeline_mode<synchronous>, transform_indices = @transform_10, window_bounds = array<i64: 32, 1>}, {pipeline_mode = #tpu.pipeline_mode<synchronous>, transform_indices = @transform_11, window_bounds = array<i64: 1, 1>}, {transform_indices = @transform_12, window_bounds = array<i64: 1, 128>}]} {
    %c0 = arith.constant 0 : index
    %c0_0 = arith.constant 0 : index
    %0 = vector.load %arg4[%c0, %c0_0] : memref<128x32xf32, #tpu.memory_space<vmem>>, vector<128x32xf32>
    %c0_1 = arith.constant 0 : index
    %c0_2 = arith.constant 0 : index
    %1 = vector.load %arg5[%c0_1, %c0_2] : memref<32x128xf32, #tpu.memory_space<vmem>>, vector<32x128xf32>
    %cst = arith.constant dense<0.000000e+00> : vector<128x128xf32>
    %2 = tpu.matmul %0, %1, %cst {dimension_numbers = #tpu.dot_dimension_numbers<[1], [0], [0], [1], [0, 0, 1, 1], [], []>} : vector<128x32xf32>, vector<32x128xf32>, vector<128x128xf32> -> vector<128x128xf32>
    %c0_3 = arith.constant 0 : index
    %c0_4 = arith.constant 0 : index
    %3 = vector.load %arg6[%c0_3, %c0_4] : memref<1x128xf32, #tpu.memory_space<vmem>>, vector<1x128xf32>
    %4 = vector.broadcast %3 : vector<1x128xf32> to vector<128x128xf32>
    %5 = arith.addf %2, %4 : vector<128x128xf32>
    %c0_5 = arith.constant 0 : index
    %6 = memref.load %arg1[%c0_5] : memref<1xf32, #tpu.memory_space<smem>>
    %cst_6 = arith.constant 0.000000e+00 : f32
    %7 = vector.broadcast %cst_6 : f32 to vector<128x128xf32>
    %8 = arith.cmpf ogt, %5, %7 : vector<128x128xf32>
    %9 = vector.broadcast %6 : f32 to vector<128x128xf32>
    %10 = arith.mulf %9, %5 : vector<128x128xf32>
    %11 = arith.select %8, %5, %10 : vector<128x128xi1>, vector<128x128xf32>
    %c0_7 = arith.constant 0 : index
    %c0_8 = arith.constant 0 : index
    %12 = vector.load %arg7[%c0_7, %c0_8] : memref<128x64xf32, #tpu.memory_space<vmem>>, vector<128x64xf32>
    %cst_9 = arith.constant dense<0.000000e+00> : vector<128x64xf32>
    %13 = tpu.matmul %11, %12, %cst_9 {dimension_numbers = #tpu.dot_dimension_numbers<[1], [0], [0], [1], [0, 0, 1, 1], [], []>} : vector<128x128xf32>, vector<128x64xf32>, vector<128x64xf32> -> vector<128x64xf32>
    %c0_10 = arith.constant 0 : index
    %c0_11 = arith.constant 0 : index
    %14 = vector.load %arg8[%c0_10, %c0_11] : memref<1x64xf32, #tpu.memory_space<vmem>>, vector<1x64xf32>
    %15 = vector.broadcast %14 : vector<1x64xf32> to vector<128x64xf32>
    %16 = arith.addf %13, %15 : vector<128x64xf32>
    %c0_12 = arith.constant 0 : index
    %17 = memref.load %arg2[%c0_12] : memref<1xf32, #tpu.memory_space<smem>>
    %cst_13 = arith.constant 0.000000e+00 : f32
    %18 = vector.broadcast %cst_13 : f32 to vector<128x64xf32>
    %19 = arith.cmpf ogt, %16, %18 : vector<128x64xf32>
    %20 = vector.broadcast %17 : f32 to vector<128x64xf32>
    %21 = arith.mulf %20, %16 : vector<128x64xf32>
    %22 = arith.select %19, %16, %21 : vector<128x64xi1>, vector<128x64xf32>
    %c0_14 = arith.constant 0 : index
    %c0_15 = arith.constant 0 : index
    %23 = vector.load %arg9[%c0_14, %c0_15] : memref<64x32xf32, #tpu.memory_space<vmem>>, vector<64x32xf32>
    %cst_16 = arith.constant dense<0.000000e+00> : vector<128x32xf32>
    %24 = tpu.matmul %22, %23, %cst_16 {dimension_numbers = #tpu.dot_dimension_numbers<[1], [0], [0], [1], [0, 0, 1, 1], [], []>} : vector<128x64xf32>, vector<64x32xf32>, vector<128x32xf32> -> vector<128x32xf32>
    %c0_17 = arith.constant 0 : index
    %c0_18 = arith.constant 0 : index
    %25 = vector.load %arg10[%c0_17, %c0_18] : memref<1x32xf32, #tpu.memory_space<vmem>>, vector<1x32xf32>
    %26 = vector.broadcast %25 : vector<1x32xf32> to vector<128x32xf32>
    %27 = arith.addf %24, %26 : vector<128x32xf32>
    %c0_19 = arith.constant 0 : index
    %28 = memref.load %arg3[%c0_19] : memref<1xf32, #tpu.memory_space<smem>>
    %cst_20 = arith.constant 0.000000e+00 : f32
    %29 = vector.broadcast %cst_20 : f32 to vector<128x32xf32>
    %30 = arith.cmpf ogt, %27, %29 : vector<128x32xf32>
    %31 = vector.broadcast %28 : f32 to vector<128x32xf32>
    %32 = arith.mulf %31, %27 : vector<128x32xf32>
    %33 = arith.select %30, %27, %32 : vector<128x32xi1>, vector<128x32xf32>
    %c0_21 = arith.constant 0 : index
    %c0_22 = arith.constant 0 : index
    %34 = vector.load %arg11[%c0_21, %c0_22] : memref<32x1xf32, #tpu.memory_space<vmem>>, vector<32x1xf32>
    %cst_23 = arith.constant dense<0.000000e+00> : vector<128x1xf32>
    %35 = tpu.matmul %33, %34, %cst_23 {dimension_numbers = #tpu.dot_dimension_numbers<[1], [0], [0], [1], [0, 0, 1, 1], [], []>} : vector<128x32xf32>, vector<32x1xf32>, vector<128x1xf32> -> vector<128x1xf32>
    %c0_24 = arith.constant 0 : index
    %c0_25 = arith.constant 0 : index
    %36 = vector.load %arg12[%c0_24, %c0_25] : memref<1x1xf32, #tpu.memory_space<vmem>>, vector<1x1xf32>
    %37 = vector.broadcast %36 : vector<1x1xf32> to vector<128x1xf32>
    %38 = arith.addf %35, %37 : vector<128x1xf32>
    %39 = tpu.transpose %38, [1, 0] : vector<128x1xf32> -> vector<1x128xf32>
    %c0_26 = arith.constant 0 : index
    %c0_27 = arith.constant 0 : index
    %40 = vector.load %arg13[%c0_26, %c0_27] : memref<1x128xf32, #tpu.memory_space<vmem>>, vector<1x128xf32>
    tpu.vector_store %arg13[%c0_26, %c0_27], %39 {strides = array<i32>} : memref<1x128xf32, #tpu.memory_space<vmem>>, vector<1x128xf32>,
    return
  }
  func.func @transform_0(%arg0: i32) -> i32 {
    %c0_i32 = arith.constant 0 : i32
    %c0_i32_0 = arith.constant 0 : i32
    return %c0_i32 : i32
  }
  func.func @transform_1(%arg0: i32) -> i32 {
    %c0_i32 = arith.constant 0 : i32
    %c0_i32_0 = arith.constant 0 : i32
    return %c0_i32 : i32
  }
  func.func @transform_2(%arg0: i32) -> i32 {
    %c0_i32 = arith.constant 0 : i32
    %c0_i32_0 = arith.constant 0 : i32
    return %c0_i32 : i32
  }
  func.func @transform_3(%arg0: i32) -> (i32, i32) {
    %c0_i32 = arith.constant 0 : i32
    %c0_i32_0 = arith.constant 0 : i32
    return %arg0, %c0_i32 : i32, i32
  }
  func.func @transform_4(%arg0: i32) -> (i32, i32) {
    %c0_i32 = arith.constant 0 : i32
    %c0_i32_0 = arith.constant 0 : i32
    %c0_i32_1 = arith.constant 0 : i32
    return %c0_i32, %c0_i32_0 : i32, i32
  }
  func.func @transform_5(%arg0: i32) -> (i32, i32) {
    %c0_i32 = arith.constant 0 : i32
    %c0_i32_0 = arith.constant 0 : i32
    %c0_i32_1 = arith.constant 0 : i32
    return %c0_i32, %c0_i32_0 : i32, i32
  }
  func.func @transform_6(%arg0: i32) -> (i32, i32) {
    %c0_i32 = arith.constant 0 : i32
    %c0_i32_0 = arith.constant 0 : i32
    %c0_i32_1 = arith.constant 0 : i32
    return %c0_i32, %c0_i32_0 : i32, i32
  }
  func.func @transform_7(%arg0: i32) -> (i32, i32) {
    %c0_i32 = arith.constant 0 : i32
    %c0_i32_0 = arith.constant 0 : i32
    %c0_i32_1 = arith.constant 0 : i32
    return %c0_i32, %c0_i32_0 : i32, i32
  }
  func.func @transform_8(%arg0: i32) -> (i32, i32) {
    %c0_i32 = arith.constant 0 : i32
    %c0_i32_0 = arith.constant 0 : i32
    %c0_i32_1 = arith.constant 0 : i32
    return %c0_i32, %c0_i32_0 : i32, i32
  }
  func.func @transform_9(%arg0: i32) -> (i32, i32) {
    %c0_i32 = arith.constant 0 : i32
    %c0_i32_0 = arith.constant 0 : i32
    %c0_i32_1 = arith.constant 0 : i32
    return %c0_i32, %c0_i32_0 : i32, i32
  }
  func.func @transform_10(%arg0: i32) -> (i32, i32) {
    %c0_i32 = arith.constant 0 : i32
    %c0_i32_0 = arith.constant 0 : i32
    %c0_i32_1 = arith.constant 0 : i32
    return %c0_i32, %c0_i32_0 : i32, i32
  }
  func.func @transform_11(%arg0: i32) -> (i32, i32) {
    %c0_i32 = arith.constant 0 : i32
    %c0_i32_0 = arith.constant 0 : i32
    %c0_i32_1 = arith.constant 0 : i32
    return %c0_i32, %c0_i32_0 : i32, i32
  }
  func.func @transform_12(%arg0: i32) -> (i32, i32) {
    %c0_i32 = arith.constant 0 : i32
    %c0_i32_0 = arith.constant 0 : i32
    return %c0_i32, %arg0 : i32, i32
  }
}

</mosaic_0001>

<bundles_post_ra>
// kernel: tpu_custom_call.1
= control target key start
LH: loop header
LB: loop body
LE: loop exit
PB: predicated region body
PF: predicated region fallthrough
CT: control target
= control target key end

     0   :  { %s1205_s0 = inlined_call_operand.<no memory space> [shape: f32[1], index: 0, kind: input, shape index: {}]   ;;  %s1206_s1 = inlined_call_operand.<no memory space> [shape: f32[1], index: 1, kind: input, shape index: {}]   ;;  %s1207_s2 = inlined_call_operand.<no memory space> [shape: f32[1], index: 2, kind: input, shape index: {}]   ;;  %s1208_s3 = inlined_call_operand.vmem [shape: f32[8,32], index: 3, kind: input, shape index: {}]   ;;  %s1209_s4 = inlined_call_operand.vmem [shape: f32[32,128], index: 4, kind: input, shape index: {}]   ;;  %s1210_s5 = inlined_call_operand.vmem [shape: f32[1,128], index: 5, kind: input, shape index: {}]   ;;  %s1211_s6 = inlined_call_operand.vmem [shape: f32[128,64], index: 6, kind: input, shape index: {}]   ;;  %s1212_s7 = inlined_call_operand.vmem [shape: f32[1,64], index: 7, kind: input, shape index: {}]   ;;  %s1213_s8 = inlined_call_operand.vmem [shape: f32[64,32], index: 8, kind: input, shape index: {}]   ;;  %s1214_s9 = inlined_call_operand.vmem [shape: f32[1,32], index: 9, kind: input, shape index: {}]   ;;  %s1215_s10 = inlined_call_operand.vmem [shape: f32[32,1], index: 10, kind: input, shape index: {}]   ;;  %s1216_s11 = inlined_call_operand.<no memory space> [shape: f32[1,1], index: 11, kind: input, shape index: {}]   ;;  %s1217_s12 = inlined_call_operand.hbm [shape: f32[1,8], index: 12, kind: output, shape index: {}]  }
   0x1   :  { %v20_v0 = vstv %s1216_s11 }
   0x2   :  { %21 = vst [vmem:[#allocation5] sm:$0x1] %v20_v0 }
   0x3   :  { %v66_v1 = vld [vmem:[%s1209_s4 + $0x18] sm:$0xff]  ;;  %v65_v2 = vld [vmem:[%s1209_s4 + $0x10] sm:$0xff]  ;;  %v64_v3 = vld [vmem:[%s1209_s4 + $0x8] sm:$0xff]  ;;  %vm71_vm0 = vcmask 261120  }
   0x4   :  { %132 = vmatpush.msra.mxu0 %v66_v1  ;;  %764 = vmatpush.msra.mxu3 %v66_v1  ;;  %v63_v4 = vld [vmem:[%s1209_s4] sm:$0xff]  ;;  %v250_v6 = vld [vmem:[%s1211_s6 + $0x78] sm:$0xff]  ;;  %v249_v7 = vld [vmem:[%s1211_s6 + $0x70] sm:$0xff] }
   0x5   :  { %v47_v5 = vld [vmem:[%s1208_s3] sm:$0xff]  ;;  %768 = vmatpush.msra.mxu1 %v250_v6 }
   0x6   :  { %133 = vmatpush.msra.mxu0 %v65_v2  ;;  %765 = vmatpush.msra.mxu3 %v65_v2 }
   0x8   :  { %134 = vmatpush.msra.mxu0 %v64_v3  ;;  %766 = vmatpush.msra.mxu3 %v64_v3 }
   0x9   :  { %22 = vsyncpa [#allocation7], 0  ;;  %769 = vmatpush.msra.mxu1 %v249_v7  ;;  %v248_v8 = vld [vmem:[%s1211_s6 + $0x68] sm:$0xff]  ;;  %v247_v9 = vld [vmem:[%s1211_s6 + $0x60] sm:$0xff]  ;;  %v1016_v39 = vstv %s1205_s0  ;;  %s707_s21 = sshll.u32 %s1217_s12, 4  ;;  %s708_s21 = int_to_ptr.hbm [resolvable:$true] %s707_s21 }
   0xa   :  { %135 = vmatpush.msra.mxu0 %v63_v4  ;;  %767 = vmatpush.msra.mxu3 %v63_v4  ;;  %v48_v10 = vld [vmem:[%s1208_s3 + $0x8] sm:$0xff]  ;;  %v246_v11 = vld [vmem:[%s1211_s6 + $0x58] sm:$0xff]  ;;  %v49_v12 = vld [vmem:[%s1208_s3 + $0x10] sm:$0xff] }
   0xb   :  { %716 = vmatmul.msk.f32.vlgmr.msra.gmra.mxu0 %vm71_vm0, %v47_v5  ;;  %770 = vmatpush.msra.mxu1 %v248_v8  ;;  %v245_v13 = vld [vmem:[%s1211_s6 + $0x50] sm:$0xff]  ;;  %v50_v14 = vld [vmem:[%s1208_s3 + $0x18] sm:$0xff]  ;;  %v244_v15 = vld [vmem:[%s1211_s6 + $0x48] sm:$0xff] }
   0xc   :  { %255 = vmatpush.msrb.mxu0 %v250_v6  ;;  %v51_v16 = vld [vmem:[%s1208_s3 + $0x20] sm:$0xff]  ;;  %v242_v18 = vld [vmem:[%s1211_s6 + $0x38] sm:$0xff]  ;;  %v52_v19 = vld [vmem:[%s1208_s3 + $0x28] sm:$0xff] }
   0xd   :  { %771 = vmatpush.msra.mxu1 %v247_v9  ;;  %v243_v17 = vld [vmem:[%s1211_s6 + $0x40] sm:$0xff]  ;;  %v241_v20 = vld [vmem:[%s1211_s6 + $0x30] sm:$0xff]  ;;  %v240_v22 = vld [vmem:[%s1211_s6 + $0x28] sm:$0xff] }
   0xe   :  { %256 = vmatpush.msrb.mxu0 %v249_v7  ;;  %v53_v21 = vld [vmem:[%s1208_s3 + $0x30] sm:$0xff]  ;;  %v54_v23 = vld [vmem:[%s1208_s3 + $0x38] sm:$0xff]  ;;  %v239_v24 = vld [vmem:[%s1211_s6 + $0x20] sm:$0xff] }
   0xf   :  { %772 = vmatpush.msra.mxu1 %v246_v11  ;;  %v55_v25 = vld [vmem:[%s1208_s3 + $0x40] sm:$0xff]  ;;  %v238_v26 = vld [vmem:[%s1211_s6 + $0x18] sm:$0xff]  ;;  %v56_v27 = vld [vmem:[%s1208_s3 + $0x48] sm:$0xff] }
  0x10   :  { %257 = vmatpush.msrb.mxu0 %v248_v8  ;;  %v237_v28 = vld [vmem:[%s1211_s6 + $0x10] sm:$0xff]  ;;  %v62_v30 = vld [vmem:[%s1208_s3 + $0x78] sm:$0xff]  ;;  %v236_v31 = vld [vmem:[%s1211_s6 + $0x8] sm:$0xff] }
  0x11   :  { %773 = vmatpush.msra.mxu1 %v245_v13  ;;  %v57_v29 = vld [vmem:[%s1208_s3 + $0x50] sm:$0xff]  ;;  %731 = vmatmul.msk.f32.vlgmr.msra.gmra.mxu3 %vm71_vm0, %v62_v30  ;;  %v235_v32 = vld [vmem:[%s1211_s6] sm:$0xff]  ;;  %v58_v33 = vld [vmem:[%s1208_s3 + $0x58] sm:$0xff] }
  0x12   :  { %258 = vmatpush.msrb.mxu0 %v247_v9  ;;  %v59_v34 = vld [vmem:[%s1208_s3 + $0x60] sm:$0xff]  ;;  %v60_v35 = vld [vmem:[%s1208_s3 + $0x68] sm:$0xff]  ;;  %v61_v36 = vld [vmem:[%s1208_s3 + $0x70] sm:$0xff] }
  0x13   :  { %717 = vmatmul.msk.f32.gmra.mxu0 %vm71_vm0, %v48_v10  ;;  %774 = vmatpush.msra.mxu1 %v244_v15  ;;  %v1011_v37 = vld [vmem:[%s1210_s5] ss:$0 sm:$0xff] }
  0x14   :  { %259 = vmatpush.msrb.mxu0 %v246_v11 }
  0x15   :  { %775 = vmatpush.msra.mxu1 %v243_v17 }
  0x16   :  { %260 = vmatpush.msrb.mxu0 %v245_v13 }
  0x17   :  { %776 = vmatpush.msra.mxu1 %v242_v18 }
  0x18   :  { %261 = vmatpush.msrb.mxu0 %v244_v15 }
  0x19   :  { %777 = vmatpush.msra.mxu1 %v241_v20 }
  0x1a   :  { %262 = vmatpush.msrb.mxu0 %v243_v17 }
  0x1b   :  { %718 = vmatmul.msk.f32.gmra.mxu0 %vm71_vm0, %v49_v12  ;;  %778 = vmatpush.msra.mxu1 %v240_v22 }
  0x1c   :  { %263 = vmatpush.msrb.mxu0 %v242_v18 }
  0x1d   :  { %779 = vmatpush.msra.mxu1 %v239_v24 }
  0x1e   :  { %264 = vmatpush.msrb.mxu0 %v241_v20  ;;  %v376_v20 = vld [vmem:[%s1213_s8 + $0x30] sm:$0xff] }
  0x1f   :  { %780 = vmatpush.msra.mxu1 %v238_v26 }
  0x20   :  { %265 = vmatpush.msrb.mxu0 %v240_v22 }
  0x21   :  { %781 = vmatpush.msra.mxu1 %v237_v28 }
  0x22   :  { %266 = vmatpush.msrb.mxu0 %v239_v24 }
  0x23   :  { %719 = vmatmul.msk.f32.gmra.mxu0 %vm71_vm0, %v50_v14  ;;  %782 = vmatpush.msra.mxu1 %v236_v31 }
  0x24   :  { %267 = vmatpush.msrb.mxu0 %v238_v26  ;;  %v374_v26 = vld [vmem:[%s1213_s8 + $0x20] sm:$0xff] }
  0x25   :  { %783 = vmatpush.msra.mxu1 %v235_v32 }
  0x26   :  { %268 = vmatpush.msrb.mxu0 %v237_v28 }
  0x28   :  { %269 = vmatpush.msrb.mxu0 %v236_v31  ;;  %v372_v31 = vld [vmem:[%s1213_s8 + $0x10] sm:$0xff] }
  0x2a   :  { %270 = vmatpush.msrb.mxu0 %v235_v32 }
  0x2b   :  { %720 = vmatmul.msk.f32.gmra.mxu0 %vm71_vm0, %v51_v16 }
  0x33   :  { %721 = vmatmul.msk.f32.gmra.mxu0 %vm71_vm0, %v52_v19  ;;  %v377_v19 = vld [vmem:[%s1213_s8 + $0x38] sm:$0xff] }
  0x34   :  { %439 = vmatpush.msra.mxu2 %v377_v19 }
  0x36   :  { %440 = vmatpush.msra.mxu2 %v376_v20 }
  0x3b   :  { %722 = vmatmul.msk.f32.gmra.mxu0 %vm71_vm0, %v53_v21 }
  0x43   :  { %723 = vmatmul.msk.f32.gmra.mxu0 %vm71_vm0, %v54_v23 }
  0x4b   :  { %724 = vmatmul.msk.f32.gmra.mxu0 %vm71_vm0, %v55_v25  ;;  %v375_v25 = vld [vmem:[%s1213_s8 + $0x28] sm:$0xff] }
  0x4c   :  { %441 = vmatpush.msra.mxu2 %v375_v25 }
  0x4e   :  { %442 = vmatpush.msra.mxu2 %v374_v26 }
  0x53   :  { %725 = vmatmul.msk.f32.gmra.mxu0 %vm71_vm0, %v56_v27  ;;  %v373_v27 = vld [vmem:[%s1213_s8 + $0x18] sm:$0xff] }
  0x54   :  { %443 = vmatpush.msra.mxu2 %v373_v27 }
  0x56   :  { %444 = vmatpush.msra.mxu2 %v372_v31 }
  0x5b   :  { %726 = vmatmul.msk.f32.gmra.mxu0 %vm71_vm0, %v57_v29 }
  0x63   :  { %727 = vmatmul.msk.f32.gmra.mxu0 %vm71_vm0, %v58_v33  ;;  %v371_v33 = vld [vmem:[%s1213_s8 + $0x8] sm:$0xff] }
  0x64   :  { %445 = vmatpush.msra.mxu2 %v371_v33  ;;  %v549_v33 = vld [vmem:[%s1215_s10 + $0x18] sm:$0xff] }
  0x65   :  { %614 = vmatpush.msrb.mxu3 %v549_v33 }
  0x6b   :  { %728 = vmatmul.msk.f32.gmra.mxu0 %vm71_vm0, %v59_v34  ;;  %v370_v34 = vld [vmem:[%s1213_s8] sm:$0xff] }
  0x6c   :  { %446 = vmatpush.msra.mxu2 %v370_v34 }
  0x73   :  { %729 = vmatmul.msk.f32.gmra.mxu0 %vm71_vm0, %v60_v35 }
  0x7b   :  { %730 = vmatmul.msk.f32.gmra.mxu0 %vm71_vm0, %v61_v36 }
  0x88   :  { %v137_v38 = vpop.f32.mrf.mxu0 }
  0x89   :  { %v138_v40 = vadd.f32 %v1011_v37, %v137_v38 }
  0x8b   :  { %v203_v41 = vmul.f32 %v1016_v39, %v138_v40  ;;  %vm186_vm1 = vcmp.gt.f32.partialorder %v138_v40, 0.0 }
  0x8d   :  { %v219_v42 = vsel %vm186_vm1, %v138_v40, %v203_v41 }
  0x8e   :  { %271 = vmatmul.f32.vlgmr.msrb.gmra.mxu0 %v219_v42 }
  0x90   :  { %v140_v43 = vpop.f32.mrf.mxu0 }
  0x91   :  { %v141_v44 = vadd.f32 %v1011_v37, %v140_v43 }
  0x93   :  { %vm187_vm2 = vcmp.gt.f32.partialorder %v141_v44, 0.0  ;;  %v204_v45 = vmul.f32 %v1016_v39, %v141_v44 }
  0x94   :  { %v182_v43 = vpop.f32.mrf.mxu3 }
  0x95   :  { %v220_v46 = vsel %vm187_vm2, %v141_v44, %v204_v45  ;;  %v183_v45 = vadd.f32 %v1011_v37, %v182_v43 }
  0x96   :  { %274 = vmatmul.f32.gmra.mxu0 %v220_v46 }
  0x97   :  { %vm201_vm1 = vcmp.gt.f32.partialorder %v183_v45, 0.0 }
  0x98   :  { %v143_v47 = vpop.f32.mrf.mxu0 }
  0x99   :  { %v144_v48 = vadd.f32 %v1011_v37, %v143_v47  ;;  %v218_v47 = vmul.f32 %v1016_v39, %v183_v45 }
  0x9b   :  { %vm188_vm3 = vcmp.gt.f32.partialorder %v144_v48, 0.0  ;;  %v205_v49 = vmul.f32 %v1016_v39, %v144_v48 }
  0x9d   :  { %v221_v50 = vsel %vm188_vm3, %v144_v48, %v205_v49  ;;  %v234_v48 = vsel %vm201_vm1, %v183_v45, %v218_v47  ;;  %v1077_v49 = vld [vmem:[%s1212_s7] ss:$0 sm:$0xff]  ;;  %vm382_vm3 = vcmask 523264  }
  0x9e   :  { %277 = vmatmul.f32.vlgmr.msra.gmra.mxu1 %v221_v50  ;;  %v546_v45 = vld [vmem:[%s1215_s10] sm:$0xff] }
  0xa0   :  { %v146_v51 = vpop.f32.mrf.mxu0 }
  0xa1   :  { %v147_v52 = vadd.f32 %v1011_v37, %v146_v51  ;;  %v1082_v51 = vstv %s1206_s1 }
  0xa3   :  { %vm189_vm4 = vcmp.gt.f32.partialorder %v147_v52, 0.0  ;;  %v206_v53 = vmul.f32 %v1016_v39, %v147_v52 }
  0xa5   :  { %v222_v54 = vsel %vm189_vm4, %v147_v52, %v206_v53 }
  0xa6   :  { %280 = vmatmul.f32.gmra.mxu1 %v222_v54 }
  0xa8   :  { %v149_v55 = vpop.f32.mrf.mxu0 }
  0xa9   :  { %v150_v56 = vadd.f32 %v1011_v37, %v149_v55 }
  0xab   :  { %vm190_vm5 = vcmp.gt.f32.partialorder %v150_v56, 0.0  ;;  %v207_v57 = vmul.f32 %v1016_v39, %v150_v56 }
  0xad   :  { %v223_v58 = vsel %vm190_vm5, %v150_v56, %v207_v57 }
  0xae   :  { %283 = vmatmul.f32.gmra.mxu1 %v223_v58 }
  0xb0   :  { %v152_v59 = vpop.f32.mrf.mxu0 }
  0xb1   :  { %v153_v60 = vadd.f32 %v1011_v37, %v152_v59 }
  0xb3   :  { %vm191_vm6 = vcmp.gt.f32.partialorder %v153_v60, 0.0  ;;  %v208_v61 = vmul.f32 %v1016_v39, %v153_v60 }
  0xb5   :  { %v224_v62 = vsel %vm191_vm6, %v153_v60, %v208_v61 }
  0xb6   :  { %286 = vmatmul.f32.gmra.mxu1 %v224_v62 }
  0xb8   :  { %v155_v63 = vpop.f32.mrf.mxu0 }
  0xb9   :  { %v156_v0 = vadd.f32 %v1011_v37, %v155_v63 }
  0xbb   :  { %vm192_vm7 = vcmp.gt.f32.partialorder %v156_v0, 0.0  ;;  %v209_v1 = vmul.f32 %v1016_v39, %v156_v0 }
  0xbd   :  { %v225_v2 = vsel %vm192_vm7, %v156_v0, %v209_v1 }
  0xbe   :  { %289 = vmatmul.f32.gmra.mxu1 %v225_v2 }
  0xc0   :  { %v158_v3 = vpop.f32.mrf.mxu0 }
  0xc1   :  { %v159_v4 = vadd.f32 %v1011_v37, %v158_v3 }
  0xc3   :  { %vm193_vm8 = vcmp.gt.f32.partialorder %v159_v4, 0.0  ;;  %v210_v5 = vmul.f32 %v1016_v39, %v159_v4 }
  0xc5   :  { %v226_v6 = vsel %vm193_vm8, %v159_v4, %v210_v5 }
  0xc6   :  { %292 = vmatmul.f32.gmra.mxu1 %v226_v6 }
  0xc8   :  { %v161_v7 = vpop.f32.mrf.mxu0 }
  0xc9   :  { %v162_v8 = vadd.f32 %v1011_v37, %v161_v7 }
  0xcb   :  { %vm194_vm9 = vcmp.gt.f32.partialorder %v162_v8, 0.0  ;;  %v211_v9 = vmul.f32 %v1016_v39, %v162_v8 }
  0xcd   :  { %v227_v10 = vsel %vm194_vm9, %v162_v8, %v211_v9 }
  0xce   :  { %295 = vmatmul.f32.gmra.mxu1 %v227_v10 }
  0xd0   :  { %v164_v11 = vpop.f32.mrf.mxu0 }
  0xd1   :  { %v165_v12 = vadd.f32 %v1011_v37, %v164_v11 }
  0xd3   :  { %vm195_vm10 = vcmp.gt.f32.partialorder %v165_v12, 0.0  ;;  %v212_v13 = vmul.f32 %v1016_v39, %v165_v12 }
  0xd5   :  { %v228_v14 = vsel %vm195_vm10, %v165_v12, %v212_v13 }
  0xd6   :  { %298 = vmatmul.f32.gmra.mxu1 %v228_v14 }
  0xd8   :  { %v167_v15 = vpop.f32.mrf.mxu0 }
  0xd9   :  { %v168_v16 = vadd.f32 %v1011_v37, %v167_v15 }
  0xdb   :  { %vm196_vm11 = vcmp.gt.f32.partialorder %v168_v16, 0.0  ;;  %v213_v17 = vmul.f32 %v1016_v39, %v168_v16 }
  0xdd   :  { %v229_v18 = vsel %vm196_vm11, %v168_v16, %v213_v17 }
  0xde   :  { %301 = vmatmul.f32.gmra.mxu1 %v229_v18 }
  0xe0   :  { %v170_v21 = vpop.f32.mrf.mxu0 }
  0xe1   :  { %v171_v22 = vadd.f32 %v1011_v37, %v170_v21 }
  0xe3   :  { %vm197_vm12 = vcmp.gt.f32.partialorder %v171_v22, 0.0  ;;  %v214_v23 = vmul.f32 %v1016_v39, %v171_v22 }
  0xe5   :  { %v230_v24 = vsel %vm197_vm12, %v171_v22, %v214_v23 }
  0xe6   :  { %304 = vmatmul.f32.gmra.mxu1 %v230_v24 }
  0xe8   :  { %v173_v28 = vpop.f32.mrf.mxu0 }
  0xe9   :  { %v174_v29 = vadd.f32 %v1011_v37, %v173_v28 }
  0xeb   :  { %vm198_vm13 = vcmp.gt.f32.partialorder %v174_v29, 0.0  ;;  %v215_v30 = vmul.f32 %v1016_v39, %v174_v29 }
  0xed   :  { %v231_v32 = vsel %vm198_vm13, %v174_v29, %v215_v30 }
  0xee   :  { %307 = vmatmul.f32.gmra.mxu1 %v231_v32 }
  0xf0   :  { %v176_v35 = vpop.f32.mrf.mxu0 }
  0xf1   :  { %v177_v36 = vadd.f32 %v1011_v37, %v176_v35 }
  0xf3   :  { %vm199_vm14 = vcmp.gt.f32.partialorder %v177_v36, 0.0  ;;  %v216_v38 = vmul.f32 %v1016_v39, %v177_v36 }
  0xf5   :  { %v232_v40 = vsel %vm199_vm14, %v177_v36, %v216_v38 }
  0xf6   :  { %310 = vmatmul.f32.gmra.mxu1 %v232_v40 }
  0xf8   :  { %v179_v41 = vpop.f32.mrf.mxu0 }
  0xf9   :  { %v180_v42 = vadd.f32 %v1011_v37, %v179_v41 }
  0xfb   :  { %vm200_vm15 = vcmp.gt.f32.partialorder %v180_v42, 0.0  ;;  %v217_v44 = vmul.f32 %v1016_v39, %v180_v42 }
  0xfd   :  { %v233_v46 = vsel %vm200_vm15, %v180_v42, %v217_v44  ;;  %v548_v42 = vld [vmem:[%s1215_s10 + $0x10] sm:$0xff]  ;;  %v547_v44 = vld [vmem:[%s1215_s10 + $0x8] sm:$0xff] }
  0xfe   :  { %313 = vmatmul.f32.gmra.mxu1 %v233_v46  ;;  %615 = vmatpush.msrb.mxu3 %v548_v42 }
 0x100   :  { %616 = vmatpush.msrb.mxu3 %v547_v44 }
 0x102   :  { %617 = vmatpush.msrb.mxu3 %v546_v45 }
 0x106   :  { %316 = vmatmul.f32.gmra.mxu1 %v234_v48 }
 0x10b   :  { %v272_v50 = vpop.f32.mrf.mxu0 }
 0x10c   :  { %v273_v37 = vadd.f32 %v1077_v49, %v272_v50 }
 0x10e   :  { %v338_v52 = vmul.f32 %v1082_v51, %v273_v37  ;;  %vm321_vm2 = vcmp.gt.f32.partialorder %v273_v37, 0.0 }
 0x110   :  { %v354_v39 = vsel %vm321_vm2, %v273_v37, %v338_v52 }
 0x111   :  { %732 = vmatmul.msk.f32.vlgmr.msra.gmra.mxu2 %vm382_vm3, %v354_v39 }
 0x113   :  { %v275_v53 = vpop.f32.mrf.mxu0 }
 0x114   :  { %v276_v54 = vadd.f32 %v1077_v49, %v275_v53 }
 0x116   :  { %v339_v55 = vmul.f32 %v1082_v51, %v276_v54  ;;  %vm322_vm4 = vcmp.gt.f32.partialorder %v276_v54, 0.0 }
 0x118   :  { %v355_v56 = vsel %vm322_vm4, %v276_v54, %v339_v55  ;;  %v1147_v55 = vld [vmem:[%s1214_s9] ss:$0 sm:$0xff] }
 0x119   :  { %733 = vmatmul.msk.f32.gmra.mxu2 %vm382_vm3, %v355_v56 }
 0x11b   :  { %v278_v57 = vpop.f32.mrf.mxu1 }
 0x11c   :  { %v279_v58 = vadd.f32 %v1077_v49, %v278_v57  ;;  %v1152_v57 = vstv %s1207_s2  ;;  %s815_s2 = smov [#allocation6]  }
 0x11d   :  { %s705_s9 = sshll.u32 %s815_s2, 4  ;;  %s706_s9 = int_to_ptr.vmem [resolvable:$true] %s705_s9 }
 0x11e   :  { %v340_v59 = vmul.f32 %v1082_v51, %v279_v58  ;;  %vm323_vm5 = vcmp.gt.f32.partialorder %v279_v58, 0.0 }
 0x120   :  { %v356_v60 = vsel %vm323_vm5, %v279_v58, %v340_v59 }
 0x121   :  { %734 = vmatmul.msk.f32.gmra.mxu2 %vm382_vm3, %v356_v60 }
 0x123   :  { %v281_v61 = vpop.f32.mrf.mxu1 }
 0x124   :  { %v282_v62 = vadd.f32 %v1077_v49, %v281_v61 }
 0x126   :  { %v341_v63 = vmul.f32 %v1082_v51, %v282_v62  ;;  %vm324_vm6 = vcmp.gt.f32.partialorder %v282_v62, 0.0 }
 0x128   :  { %v357_v0 = vsel %vm324_vm6, %v282_v62, %v341_v63 }
 0x129   :  { %735 = vmatmul.msk.f32.gmra.mxu2 %vm382_vm3, %v357_v0 }
 0x12b   :  { %v284_v1 = vpop.f32.mrf.mxu1 }
 0x12c   :  { %v285_v2 = vadd.f32 %v1077_v49, %v284_v1 }
 0x12e   :  { %v342_v3 = vmul.f32 %v1082_v51, %v285_v2  ;;  %vm325_vm7 = vcmp.gt.f32.partialorder %v285_v2, 0.0 }
 0x130   :  { %v358_v4 = vsel %vm325_vm7, %v285_v2, %v342_v3 }
 0x131   :  { %736 = vmatmul.msk.f32.gmra.mxu2 %vm382_vm3, %v358_v4 }
 0x133   :  { %v287_v5 = vpop.f32.mrf.mxu1 }
 0x134   :  { %v288_v6 = vadd.f32 %v1077_v49, %v287_v5 }
 0x136   :  { %v343_v7 = vmul.f32 %v1082_v51, %v288_v6  ;;  %vm326_vm8 = vcmp.gt.f32.partialorder %v288_v6, 0.0 }
 0x138   :  { %v359_v8 = vsel %vm326_vm8, %v288_v6, %v343_v7 }
 0x139   :  { %737 = vmatmul.msk.f32.gmra.mxu2 %vm382_vm3, %v359_v8 }
 0x13b   :  { %v290_v9 = vpop.f32.mrf.mxu1 }
 0x13c   :  { %v291_v10 = vadd.f32 %v1077_v49, %v290_v9 }
 0x13e   :  { %v344_v11 = vmul.f32 %v1082_v51, %v291_v10  ;;  %vm327_vm9 = vcmp.gt.f32.partialorder %v291_v10, 0.0 }
 0x140   :  { %v360_v12 = vsel %vm327_vm9, %v291_v10, %v344_v11 }
 0x141   :  { %738 = vmatmul.msk.f32.gmra.mxu2 %vm382_vm3, %v360_v12 }
 0x143   :  { %v293_v13 = vpop.f32.mrf.mxu1 }
 0x144   :  { %v294_v14 = vadd.f32 %v1077_v49, %v293_v13 }
 0x146   :  { %v345_v15 = vmul.f32 %v1082_v51, %v294_v14  ;;  %vm328_vm10 = vcmp.gt.f32.partialorder %v294_v14, 0.0 }
 0x148   :  { %v361_v16 = vsel %vm328_vm10, %v294_v14, %v345_v15 }
 0x149   :  { %739 = vmatmul.msk.f32.gmra.mxu2 %vm382_vm3, %v361_v16 }
 0x14b   :  { %v296_v17 = vpop.f32.mrf.mxu1 }
 0x14c   :  { %v297_v18 = vadd.f32 %v1077_v49, %v296_v17 }
 0x14e   :  { %v346_v19 = vmul.f32 %v1082_v51, %v297_v18  ;;  %vm329_vm11 = vcmp.gt.f32.partialorder %v297_v18, 0.0 }
 0x150   :  { %v362_v20 = vsel %vm329_vm11, %v297_v18, %v346_v19 }
 0x151   :  { %740 = vmatmul.msk.f32.gmra.mxu2 %vm382_vm3, %v362_v20 }
 0x153   :  { %v299_v21 = vpop.f32.mrf.mxu1 }
 0x154   :  { %v300_v22 = vadd.f32 %v1077_v49, %v299_v21 }
 0x156   :  { %v347_v23 = vmul.f32 %v1082_v51, %v300_v22  ;;  %vm330_vm12 = vcmp.gt.f32.partialorder %v300_v22, 0.0 }
 0x158   :  { %v363_v24 = vsel %vm330_vm12, %v300_v22, %v347_v23 }
 0x159   :  { %741 = vmatmul.msk.f32.gmra.mxu2 %vm382_vm3, %v363_v24 }
 0x15b   :  { %v302_v25 = vpop.f32.mrf.mxu1 }
 0x15c   :  { %v303_v26 = vadd.f32 %v1077_v49, %v302_v25 }
 0x15e   :  { %v348_v27 = vmul.f32 %v1082_v51, %v303_v26  ;;  %vm331_vm13 = vcmp.gt.f32.partialorder %v303_v26, 0.0 }
 0x160   :  { %v364_v28 = vsel %vm331_vm13, %v303_v26, %v348_v27 }
 0x161   :  { %742 = vmatmul.msk.f32.gmra.mxu2 %vm382_vm3, %v364_v28 }
 0x163   :  { %v305_v29 = vpop.f32.mrf.mxu1 }
 0x164   :  { %v306_v30 = vadd.f32 %v1077_v49, %v305_v29 }
 0x166   :  { %v349_v31 = vmul.f32 %v1082_v51, %v306_v30  ;;  %vm332_vm14 = vcmp.gt.f32.partialorder %v306_v30, 0.0 }
 0x168   :  { %v365_v32 = vsel %vm332_vm14, %v306_v30, %v349_v31 }
 0x169   :  { %743 = vmatmul.msk.f32.gmra.mxu2 %vm382_vm3, %v365_v32 }
 0x16b   :  { %v308_v34 = vpop.f32.mrf.mxu1 }
 0x16c   :  { %v309_v35 = vadd.f32 %v1077_v49, %v308_v34 }
 0x16e   :  { %v350_v36 = vmul.f32 %v1082_v51, %v309_v35  ;;  %vm333_vm15 = vcmp.gt.f32.partialorder %v309_v35, 0.0 }
 0x170   :  { %v366_v38 = vsel %vm333_vm15, %v309_v35, %v350_v36 }
 0x171   :  { %744 = vmatmul.msk.f32.gmra.mxu2 %vm382_vm3, %v366_v38 }
 0x173   :  { %v311_v40 = vpop.f32.mrf.mxu1 }
 0x174   :  { %v312_v41 = vadd.f32 %v1077_v49, %v311_v40 }
 0x176   :  { %v351_v43 = vmul.f32 %v1082_v51, %v312_v41  ;;  %vm334_vm1 = vcmp.gt.f32.partialorder %v312_v41, 0.0 }
 0x178   :  { %v367_v46 = vsel %vm334_vm1, %v312_v41, %v351_v43 }
 0x179   :  { %745 = vmatmul.msk.f32.gmra.mxu2 %vm382_vm3, %v367_v46 }
 0x17b   :  { %v314_v47 = vpop.f32.mrf.mxu1 }
 0x17c   :  { %v315_v48 = vadd.f32 %v1077_v49, %v314_v47 }
 0x17e   :  { %v352_v50 = vmul.f32 %v1082_v51, %v315_v48  ;;  %vm335_vm2 = vcmp.gt.f32.partialorder %v315_v48, 0.0 }
 0x180   :  { %v368_v37 = vsel %vm335_vm2, %v315_v48, %v352_v50 }
 0x181   :  { %746 = vmatmul.msk.f32.gmra.mxu2 %vm382_vm3, %v368_v37 }
 0x183   :  { %v317_v52 = vpop.f32.mrf.mxu1 }
 0x184   :  { %v318_v39 = vadd.f32 %v1077_v49, %v317_v52 }
 0x186   :  { %v353_v53 = vmul.f32 %v1082_v51, %v318_v39  ;;  %vm336_vm4 = vcmp.gt.f32.partialorder %v318_v39, 0.0 }
 0x188   :  { %v369_v54 = vsel %vm336_vm4, %v318_v39, %v353_v53 }
 0x189   :  { %747 = vmatmul.msk.f32.gmra.mxu2 %vm382_vm3, %v369_v54 }
 0x194   :  { %v448_v56 = vpop.f32.mrf.mxu2 }
 0x195   :  { %v449_v58 = vadd.f32 %v1147_v55, %v448_v56 }
 0x197   :  { %vm497_vm5 = vcmp.gt.f32.partialorder %v449_v58, 0.0  ;;  %v514_v49 = vmul.f32 %v1152_v57, %v449_v58 }
 0x199   :  { %v530_v51 = vsel %vm497_vm5, %v449_v58, %v514_v49  ;;  %v788_v49 = vld [vmem:[#allocation5] ss:$0 sm:$0xff] }
 0x19a   :  { %748 = vmatmul.msk.f32.vlgmr.msrb.gmra.mxu3 %vm71_vm0, %v530_v51 }
 0x19c   :  { %v451_v59 = vpop.f32.mrf.mxu2 }
 0x19d   :  { %v452_v60 = vadd.f32 %v1147_v55, %v451_v59 }
 0x19f   :  { %v515_v61 = vmul.f32 %v1152_v57, %v452_v60  ;;  %vm498_vm3 = vcmp.gt.f32.partialorder %v452_v60, 0.0 }
 0x1a1   :  { %v531_v62 = vsel %vm498_vm3, %v452_v60, %v515_v61 }
 0x1a2   :  { %749 = vmatmul.msk.f32.gmra.mxu3 %vm71_vm0, %v531_v62 }
 0x1a4   :  { %v454_v63 = vpop.f32.mrf.mxu2 }
 0x1a5   :  { %v455_v0 = vadd.f32 %v1147_v55, %v454_v63 }
 0x1a7   :  { %v516_v1 = vmul.f32 %v1152_v57, %v455_v0  ;;  %vm499_vm6 = vcmp.gt.f32.partialorder %v455_v0, 0.0 }
 0x1a9   :  { %v532_v2 = vsel %vm499_vm6, %v455_v0, %v516_v1 }
 0x1aa   :  { %750 = vmatmul.msk.f32.gmra.mxu3 %vm71_vm0, %v532_v2 }
 0x1ac   :  { %v457_v3 = vpop.f32.mrf.mxu2 }
 0x1ad   :  { %v458_v4 = vadd.f32 %v1147_v55, %v457_v3 }
 0x1af   :  { %v517_v5 = vmul.f32 %v1152_v57, %v458_v4  ;;  %vm500_vm7 = vcmp.gt.f32.partialorder %v458_v4, 0.0 }
 0x1b1   :  { %v533_v6 = vsel %vm500_vm7, %v458_v4, %v517_v5 }
 0x1b2   :  { %751 = vmatmul.msk.f32.gmra.mxu3 %vm71_vm0, %v533_v6 }
 0x1b4   :  { %v460_v7 = vpop.f32.mrf.mxu2 }
 0x1b5   :  { %v461_v8 = vadd.f32 %v1147_v55, %v460_v7 }
 0x1b7   :  { %v518_v9 = vmul.f32 %v1152_v57, %v461_v8  ;;  %vm501_vm8 = vcmp.gt.f32.partialorder %v461_v8, 0.0 }
 0x1b9   :  { %v534_v10 = vsel %vm501_vm8, %v461_v8, %v518_v9 }
 0x1ba   :  { %752 = vmatmul.msk.f32.gmra.mxu3 %vm71_vm0, %v534_v10 }
 0x1bc   :  { %v463_v11 = vpop.f32.mrf.mxu2 }
 0x1bd   :  { %v464_v12 = vadd.f32 %v1147_v55, %v463_v11 }
 0x1bf   :  { %v519_v13 = vmul.f32 %v1152_v57, %v464_v12  ;;  %vm502_vm9 = vcmp.gt.f32.partialorder %v464_v12, 0.0 }
 0x1c1   :  { %v535_v14 = vsel %vm502_vm9, %v464_v12, %v519_v13 }
 0x1c2   :  { %753 = vmatmul.msk.f32.gmra.mxu3 %vm71_vm0, %v535_v14 }
 0x1c4   :  { %v466_v15 = vpop.f32.mrf.mxu2 }
 0x1c5   :  { %v467_v16 = vadd.f32 %v1147_v55, %v466_v15 }
 0x1c7   :  { %v520_v17 = vmul.f32 %v1152_v57, %v467_v16  ;;  %vm503_vm10 = vcmp.gt.f32.partialorder %v467_v16, 0.0 }
 0x1c9   :  { %v536_v18 = vsel %vm503_vm10, %v467_v16, %v520_v17 }
 0x1ca   :  { %754 = vmatmul.msk.f32.gmra.mxu3 %vm71_vm0, %v536_v18 }
 0x1cc   :  { %v469_v19 = vpop.f32.mrf.mxu2 }
 0x1cd   :  { %v470_v20 = vadd.f32 %v1147_v55, %v469_v19 }
 0x1cf   :  { %v521_v21 = vmul.f32 %v1152_v57, %v470_v20  ;;  %vm504_vm11 = vcmp.gt.f32.partialorder %v470_v20, 0.0 }
 0x1d1   :  { %v537_v22 = vsel %vm504_vm11, %v470_v20, %v521_v21 }
 0x1d2   :  { %755 = vmatmul.msk.f32.gmra.mxu3 %vm71_vm0, %v537_v22 }
 0x1d4   :  { %v472_v23 = vpop.f32.mrf.mxu2 }
 0x1d5   :  { %v473_v24 = vadd.f32 %v1147_v55, %v472_v23 }
 0x1d7   :  { %v522_v25 = vmul.f32 %v1152_v57, %v473_v24  ;;  %vm505_vm12 = vcmp.gt.f32.partialorder %v473_v24, 0.0 }
 0x1d9   :  { %v538_v26 = vsel %vm505_vm12, %v473_v24, %v522_v25 }
 0x1da   :  { %756 = vmatmul.msk.f32.gmra.mxu3 %vm71_vm0, %v538_v26 }
 0x1dc   :  { %v475_v27 = vpop.f32.mrf.mxu2 }
 0x1dd   :  { %v476_v28 = vadd.f32 %v1147_v55, %v475_v27 }
 0x1df   :  { %v523_v29 = vmul.f32 %v1152_v57, %v476_v28  ;;  %vm506_vm13 = vcmp.gt.f32.partialorder %v476_v28, 0.0 }
 0x1e1   :  { %v539_v30 = vsel %vm506_vm13, %v476_v28, %v523_v29 }
 0x1e2   :  { %757 = vmatmul.msk.f32.gmra.mxu3 %vm71_vm0, %v539_v30 }
 0x1e4   :  { %v478_v31 = vpop.f32.mrf.mxu2 }
 0x1e5   :  { %v479_v32 = vadd.f32 %v1147_v55, %v478_v31 }
 0x1e7   :  { %v524_v33 = vmul.f32 %v1152_v57, %v479_v32  ;;  %vm507_vm14 = vcmp.gt.f32.partialorder %v479_v32, 0.0 }
 0x1e9   :  { %v540_v34 = vsel %vm507_vm14, %v479_v32, %v524_v33 }
 0x1ea   :  { %758 = vmatmul.msk.f32.gmra.mxu3 %vm71_vm0, %v540_v34 }
 0x1ec   :  { %v481_v35 = vpop.f32.mrf.mxu2 }
 0x1ed   :  { %v482_v36 = vadd.f32 %v1147_v55, %v481_v35 }
 0x1ef   :  { %v525_v38 = vmul.f32 %v1152_v57, %v482_v36  ;;  %vm508_vm15 = vcmp.gt.f32.partialorder %v482_v36, 0.0 }
 0x1f1   :  { %v541_v40 = vsel %vm508_vm15, %v482_v36, %v525_v38 }
 0x1f2   :  { %759 = vmatmul.msk.f32.gmra.mxu3 %vm71_vm0, %v541_v40 }
 0x1f4   :  { %v484_v41 = vpop.f32.mrf.mxu2 }
 0x1f5   :  { %v485_v42 = vadd.f32 %v1147_v55, %v484_v41 }
 0x1f7   :  { %v526_v43 = vmul.f32 %v1152_v57, %v485_v42  ;;  %vm509_vm1 = vcmp.gt.f32.partialorder %v485_v42, 0.0 }
 0x1f9   :  { %v542_v44 = vsel %vm509_vm1, %v485_v42, %v526_v43 }
 0x1fa   :  { %760 = vmatmul.msk.f32.gmra.mxu3 %vm71_vm0, %v542_v44 }
 0x1fc   :  { %v487_v45 = vpop.f32.mrf.mxu2 }
 0x1fd   :  { %v488_v46 = vadd.f32 %v1147_v55, %v487_v45 }
 0x1ff   :  { %v527_v47 = vmul.f32 %v1152_v57, %v488_v46  ;;  %vm510_vm2 = vcmp.gt.f32.partialorder %v488_v46, 0.0 }
 0x201   :  { %v543_v48 = vsel %vm510_vm2, %v488_v46, %v527_v47 }
 0x202   :  { %761 = vmatmul.msk.f32.gmra.mxu3 %vm71_vm0, %v543_v48 }
 0x204   :  { %v490_v50 = vpop.f32.mrf.mxu2 }
 0x205   :  { %v491_v37 = vadd.f32 %v1147_v55, %v490_v50 }
 0x207   :  { %v528_v52 = vmul.f32 %v1152_v57, %v491_v37  ;;  %vm511_vm4 = vcmp.gt.f32.partialorder %v491_v37, 0.0 }
 0x209   :  { %v544_v39 = vsel %vm511_vm4, %v491_v37, %v528_v52 }
 0x20a   :  { %762 = vmatmul.msk.f32.gmra.mxu3 %vm71_vm0, %v544_v39 }
 0x20c   :  { %v493_v53 = vpop.f32.mrf.mxu2 }
 0x20d   :  { %v494_v54 = vadd.f32 %v1147_v55, %v493_v53 }
 0x20f   :  { %v529_v56 = vmul.f32 %v1152_v57, %v494_v54  ;;  %vm512_vm5 = vcmp.gt.f32.partialorder %v494_v54, 0.0 }
 0x211   :  { %v545_v58 = vsel %vm512_vm5, %v494_v54, %v529_v56 }
 0x212   :  { %763 = vmatmul.msk.f32.gmra.mxu3 %vm71_vm0, %v545_v58 }
 0x21d   :  { %v619_v51 = vpop.f32.mrf.mxu3 }
 0x21e   :  { %v620_v59 = vadd.f32 %v788_v49, %v619_v51 }
 0x220   :  { %667 = vxpose.xlu0.b32.start [1/16] (narrow) %v620_v59, 8 }
 0x225   :  { %v622_v60 = vpop.f32.mrf.mxu3 }
 0x226   :  { %v623_v61 = vadd.f32 %v788_v49, %v622_v60 }
 0x228   :  { %668 = vxpose.xlu0.b32.cont [2/16] (narrow) %v623_v61, 8 }
 0x22d   :  { %v625_v62 = vpop.f32.mrf.mxu3 }
 0x22e   :  { %v626_v63 = vadd.f32 %v788_v49, %v625_v62 }
 0x230   :  { %669 = vxpose.xlu0.b32.cont [3/16] (narrow) %v626_v63, 8 }
 0x235   :  { %v628_v0 = vpop.f32.mrf.mxu3 }
 0x236   :  { %v629_v1 = vadd.f32 %v788_v49, %v628_v0 }
 0x238   :  { %670 = vxpose.xlu0.b32.cont [4/16] (narrow) %v629_v1, 8 }
 0x23d   :  { %v631_v55 = vpop.f32.mrf.mxu3 }
 0x23e   :  { %v632_v2 = vadd.f32 %v788_v49, %v631_v55 }
 0x240   :  { %671 = vxpose.xlu0.b32.cont [5/16] (narrow) %v632_v2, 8 }
 0x245   :  { %v634_v57 = vpop.f32.mrf.mxu3 }
 0x246   :  { %v635_v3 = vadd.f32 %v788_v49, %v634_v57 }
 0x248   :  { %672 = vxpose.xlu0.b32.cont [6/16] (narrow) %v635_v3, 8 }
 0x24d   :  { %v637_v4 = vpop.f32.mrf.mxu3 }
 0x24e   :  { %v638_v5 = vadd.f32 %v788_v49, %v637_v4 }
 0x250   :  { %673 = vxpose.xlu0.b32.cont [7/16] (narrow) %v638_v5, 8 }
 0x255   :  { %v640_v6 = vpop.f32.mrf.mxu3 }
 0x256   :  { %v641_v7 = vadd.f32 %v788_v49, %v640_v6 }
 0x258   :  { %674 = vxpose.xlu0.b32.cont [8/16] (narrow) %v641_v7, 8 }
 0x25d   :  { %v643_v8 = vpop.f32.mrf.mxu3 }
 0x25e   :  { %v644_v9 = vadd.f32 %v788_v49, %v643_v8 }
 0x260   :  { %675 = vxpose.xlu0.b32.cont [9/16] (narrow) %v644_v9, 8 }
 0x265   :  { %v646_v10 = vpop.f32.mrf.mxu3 }
 0x266   :  { %v647_v11 = vadd.f32 %v788_v49, %v646_v10 }
 0x268   :  { %676 = vxpose.xlu0.b32.cont [10/16] (narrow) %v647_v11, 8 }
 0x26d   :  { %v649_v12 = vpop.f32.mrf.mxu3 }
 0x26e   :  { %v650_v13 = vadd.f32 %v788_v49, %v649_v12 }
 0x270   :  { %677 = vxpose.xlu0.b32.cont [11/16] (narrow) %v650_v13, 8 }
 0x275   :  { %v652_v14 = vpop.f32.mrf.mxu3 }
 0x276   :  { %v653_v15 = vadd.f32 %v788_v49, %v652_v14 }
 0x278   :  { %678 = vxpose.xlu0.b32.cont [12/16] (narrow) %v653_v15, 8 }
 0x27d   :  { %v655_v16 = vpop.f32.mrf.mxu3 }
 0x27e   :  { %v656_v17 = vadd.f32 %v788_v49, %v655_v16 }
 0x280   :  { %679 = vxpose.xlu0.b32.cont [13/16] (narrow) %v656_v17, 8 }
 0x285   :  { %v658_v18 = vpop.f32.mrf.mxu3 }
 0x286   :  { %v659_v19 = vadd.f32 %v788_v49, %v658_v18 }
 0x288   :  { %680 = vxpose.xlu0.b32.cont [14/16] (narrow) %v659_v19, 8 }
 0x28d   :  { %v661_v20 = vpop.f32.mrf.mxu3 }
 0x28e   :  { %v662_v21 = vadd.f32 %v788_v49, %v661_v20 }
 0x290   :  { %681 = vxpose.xlu0.b32.cont [15/16] (narrow) %v662_v21, 8 }
 0x295   :  { %v664_v22 = vpop.f32.mrf.mxu3 }
 0x296   :  { %v665_v23 = vadd.f32 %v788_v49, %v664_v22 }
 0x298   :  { %682 = vxpose.xlu0.b32.end [16/16] (narrow) %v665_v23, 8 }
 0x2c4   :  { %v683_v24 = vpop.trf.xlu0 }
 0x2c5   :  { %699 = vst [vmem:[#allocation6] sm:$0x1] %v683_v24 }
 0x2c6   :  { %710 = dma.vmem_to_hbm [thread:$0]  %s706_s9, 16, %s708_s21, [#allocation7]  }
 0x2c7   :  { %813 = dma.done.wait [#allocation7], 16  }
 0x2c8   :  { %814 = vsyncadd [#allocation7], 4294967280 }
 0x2c9   :  { %715 = vsyncpa [#allocation7], 1 }

</bundles_post_ra>
